<compile_context>
chip_gen: v6e
topology: v6e:2x2x1
jax: 0.10.0
libtpu: 0.0.40
codegen_flags: <defaults>
</compile_context>

<pallas_src>
import functools

import jax
import jax.numpy as jnp
from jax import lax
from jax.experimental import pallas as pl
from jax.experimental.pallas import tpu as pltpu


def _round_up(v, m):
    return (v + m - 1) // m * m


def _ls_ce_kernel(x_ref, tgt_ref, loss_ref, *, smoothing, n_classes):
    """One grid step: (TB, C) logits + (TB, 1) int32 targets -> (TB, 1) per-row losses."""
    x = x_ref[...].astype(jnp.float32)                            # (TB, C)
    m = jnp.max(x, axis=-1, keepdims=True)                        # (TB, 1)
    z = x - m
    lse = jnp.log(jnp.sum(jnp.exp(z), axis=-1, keepdims=True))    # (TB, 1)

    tgt = tgt_ref[...]                                            # (TB, 1) int32
    class_ids = lax.broadcasted_iota(jnp.int32, z.shape, 1)
    z_tgt = jnp.sum(jnp.where(class_ids == tgt, z, 0.0), axis=-1, keepdims=True)
    sum_z = jnp.sum(z, axis=-1, keepdims=True)

    # (1-s)*(lse - z_tgt) + s*(lse - mean(z))  ==  lse - (1-s)*z_tgt - (s/C)*sum(z)
    loss_ref[...] = (lse
                     - (1.0 - smoothing) * z_tgt
                     - (smoothing / n_classes) * sum_z)


def _pick_block_rows(n, c, itemsize):
    # Keep one logits buffer <= ~12 MiB so the double-buffered pipeline stays <= ~24 MiB
    # (fits v7x's 64 MiB VMEM with headroom; also fine on v5e/v6e's 128 MiB).
    per_buffer_budget = 12 * 1024 * 1024
    tb = per_buffer_budget // max(1, c * itemsize)
    tb = max(8, min(1024, (tb // 8) * 8))
    tb = min(tb, _round_up(n, 8))          # don't over-pad tiny batches
    return tb


def label_smoothing_cross_entropy(x, target, smoothing=0.1, block_rows=None):
    """Matches LabelSmoothingCrossEntropy.forward(x, target): returns scalar f32."""
    N, C = x.shape
    itemsize = jnp.dtype(x.dtype).itemsize
    if block_rows is None:
        block_rows = _pick_block_rows(N, C, itemsize)
    assert block_rows % 8 == 0, "block_rows must be a multiple of 8 (sublane tiling)"

    n_pad = _round_up(N, block_rows)
    if n_pad != N:
        x = jnp.pad(x, ((0, n_pad - N), (0, 0)))          # padded rows sliced off below
        target = jnp.pad(target, (0, n_pad - N))
    tgt2 = target.reshape(n_pad, 1).astype(jnp.int32)
    grid = n_pad // block_rows

    per_row = pl.pallas_call(
        functools.partial(_ls_ce_kernel, smoothing=float(smoothing),
                          n_classes=float(C)),
        out_shape=jax.ShapeDtypeStruct((n_pad, 1), jnp.float32),
        grid_spec=pltpu.PrefetchScalarGridSpec(
            num_scalar_prefetch=0,
            grid=(grid,),
            in_specs=[
                pl.BlockSpec((block_rows, C), lambda i: (i, 0)),   # logits tile
                pl.BlockSpec((block_rows, 1), lambda i: (i, 0)),   # target tile
            ],
            out_specs=pl.BlockSpec((block_rows, 1), lambda i: (i, 0)),
        ),
        compiler_params=pltpu.CompilerParams(
            dimension_semantics=("parallel",),        # fully parallel: no carried state
            vmem_limit_bytes=48 * 1024 * 1024,
        ),
    )(x, tgt2)

    # Drop padded rows, then batch mean over the true N.
    return jnp.sum(per_row[:N, 0]) / N


def _reference(x, target, smoothing=0.1):
    logp = jax.nn.log_softmax(x.astype(jnp.float32), axis=-1)
    nll = -jnp.take_along_axis(logp, target[:, None].astype(jnp.int32), axis=-1)[:, 0]
    smooth = -jnp.mean(logp, axis=-1)
    return jnp.mean((1.0 - smoothing) * nll + smoothing * smooth)


if __name__ == "__main__":
    key = jax.random.PRNGKey(0)
    kx, kt, kx2, kt2 = jax.random.split(key, 4)

    # Small demo shapes consistent with the module's (N, C) contract: batch=16, classes=32.
    N, C = 16, 32
    x = jax.random.normal(kx, (N, C), dtype=jnp.float32)
    target = jax.random.randint(kt, (N,), 0, C, dtype=jnp.int32)
    loss = jax.block_until_ready(label_smoothing_cross_entropy(x, target, smoothing=0.1))
    ref = _reference(x, target, smoothing=0.1)
    assert jnp.allclose(loss, ref, atol=2e-5, rtol=1e-5), (loss, ref)

    # Multi-block "parallel" grid + remainder handling (N not a multiple of the tile).
    N2, C2 = 200, 128
    x2 = jax.random.normal(kx2, (N2, C2), dtype=jnp.float32)
    t2 = jax.random.randint(kt2, (N2,), 0, C2, dtype=jnp.int32)
    loss2 = jax.block_until_ready(
        label_smoothing_cross_entropy(x2, t2, smoothing=0.1, block_rows=64))
    ref2 = _reference(x2, t2, smoothing=0.1)
    assert jnp.allclose(loss2, ref2, atol=2e-5, rtol=1e-5), (loss2, ref2)

    print("KERNEL_OK")
</pallas_src>

<mosaic_0001>
module attributes {stable_mosaic.version = 11 : i64} {
  func.func @_ls_ce_kernel(%arg0: i32, %arg1: memref<16x32xf32, #tpu.memory_space<vmem>>, %arg2: memref<16x1xi32, #tpu.memory_space<vmem>>, %arg3: memref<16x1xf32, #tpu.memory_space<vmem>>) attributes {dimension_semantics = [#tpu.dimension_semantics<parallel>], iteration_bounds = array<i64: 1>, scalar_prefetch = 0 : i64, scratch_operands = 0 : i64, tpu.core_type = #tpu.core_type<tc>, window_params = [{transform_indices = @transform_0, window_bounds = array<i64: 16, 32>}, {transform_indices = @transform_1, window_bounds = array<i64: 16, 1>}, {transform_indices = @transform_2, window_bounds = array<i64: 16, 1>}]} {
    %c0 = arith.constant 0 : index
    %c0_0 = arith.constant 0 : index
    %0 = vector.load %arg1[%c0, %c0_0] : memref<16x32xf32, #tpu.memory_space<vmem>>, vector<16x32xf32>
    %cst = arith.constant dense<0xFF800000> : vector<16xf32>
    %1 = vector.multi_reduction <maximumf>, %0, %cst [1] : vector<16x32xf32> to vector<16xf32>
    %2 = vector.shape_cast %1 : vector<16xf32> to vector<16x1xf32>
    %3 = vector.broadcast %2 : vector<16x1xf32> to vector<16x32xf32>
    %4 = arith.subf %0, %3 : vector<16x32xf32>
    %5 = math.exp %4 : vector<16x32xf32>
    %cst_1 = arith.constant dense<0.000000e+00> : vector<16xf32>
    %6 = vector.multi_reduction <add>, %5, %cst_1 [1] : vector<16x32xf32> to vector<16xf32>
    %7 = vector.shape_cast %6 : vector<16xf32> to vector<16x1xf32>
    %8 = math.log %7 : vector<16x1xf32>
    %c0_2 = arith.constant 0 : index
    %c0_3 = arith.constant 0 : index
    %9 = vector.load %arg2[%c0_2, %c0_3] : memref<16x1xi32, #tpu.memory_space<vmem>>, vector<16x1xi32>
    %10 = tpu.iota {dimensions = array<i32: 1>} : vector<16x32xi32>
    %11 = vector.broadcast %9 : vector<16x1xi32> to vector<16x32xi32>
    %12 = arith.cmpi eq, %10, %11 : vector<16x32xi32>
    %cst_4 = arith.constant 0.000000e+00 : f32
    %13 = vector.broadcast %cst_4 : f32 to vector<16x32xf32>
    %14 = arith.select %12, %4, %13 : vector<16x32xi1>, vector<16x32xf32>
    %cst_5 = arith.constant dense<0.000000e+00> : vector<16xf32>
    %15 = vector.multi_reduction <add>, %14, %cst_5 [1] : vector<16x32xf32> to vector<16xf32>
    %16 = vector.shape_cast %15 : vector<16xf32> to vector<16x1xf32>
    %cst_6 = arith.constant dense<0.000000e+00> : vector<16xf32>
    %17 = vector.multi_reduction <add>, %4, %cst_6 [1] : vector<16x32xf32> to vector<16xf32>
    %18 = vector.shape_cast %17 : vector<16xf32> to vector<16x1xf32>
    %cst_7 = arith.constant 0.899999976 : f32
    %19 = vector.broadcast %cst_7 : f32 to vector<16x1xf32>
    %20 = arith.mulf %19, %16 : vector<16x1xf32>
    %21 = arith.subf %8, %20 : vector<16x1xf32>
    %cst_8 = arith.constant 3.125000e-03 : f32
    %22 = vector.broadcast %cst_8 : f32 to vector<16x1xf32>
    %23 = arith.mulf %22, %18 : vector<16x1xf32>
    %24 = arith.subf %21, %23 : vector<16x1xf32>
    %c0_9 = arith.constant 0 : index
    %c0_10 = arith.constant 0 : index
    %25 = vector.load %arg3[%c0_9, %c0_10] : memref<16x1xf32, #tpu.memory_space<vmem>>, vector<16x1xf32>
    tpu.vector_store %arg3[%c0_9, %c0_10], %24 {strides = array<i32>} : memref<16x1xf32, #tpu.memory_space<vmem>>, vector<16x1xf32>,
    return
  }
  func.func @transform_0(%arg0: i32) -> (i32, i32) {
    %c0_i32 = arith.constant 0 : i32
    %c0_i32_0 = arith.constant 0 : i32
    return %arg0, %c0_i32 : i32, i32
  }
  func.func @transform_1(%arg0: i32) -> (i32, i32) {
    %c0_i32 = arith.constant 0 : i32
    %c0_i32_0 = arith.constant 0 : i32
    return %arg0, %c0_i32 : i32, i32
  }
  func.func @transform_2(%arg0: i32) -> (i32, i32) {
    %c0_i32 = arith.constant 0 : i32
    %c0_i32_0 = arith.constant 0 : i32
    return %arg0, %c0_i32 : i32, i32
  }
}

</mosaic_0001>

<bundles_post_ra>
// kernel: tpu_custom_call.1
= control target key start
LH: loop header
LB: loop body
LE: loop exit
PB: predicated region body
PF: predicated region fallthrough
CT: control target
= control target key end

     0   :  { %vm13_vm0 = vcmask 261120   ;;  %v88_v2 = vmov 0   ;;  %v38_v13 = vlaneseq  ;;  %vm70_vm3 = vcmask 7168   ;;  %s130_s0 = inlined_call_operand.vmem [shape: f32[16,32], index: 0, kind: input, shape index: {}]   ;;  %s131_s1 = inlined_call_operand.vmem [shape: s32[16,1], index: 1, kind: input, shape index: {}]   ;;  %s132_s2 = inlined_call_operand.vmem [shape: f32[16,1], index: 2, kind: output, shape index: {}]  }
   0x1   :  { %v11_v0 = vld [vmem:[%s130_s0] sm:$0xff]  ;;  %v12_v1 = vld [vmem:[%s130_s0 + $0x8] sm:$0xff]  ;;  %78 = vset.pattern.permute.xlu1 %v88_v2  ;;  %79 = vset.pattern.permute.xlu0 %v88_v2 }
   0x2   :  { %v36_v3 = vld [vmem:[%s131_s1] sm:$0xff]  ;;  %v14_v4 = vsel %vm13_vm0, %v11_v0, -inf  ;;  %v37_v5 = vld [vmem:[%s131_s1 + $0x8] sm:$0xff]  ;;  %v17_v6 = vsel %vm13_vm0, %v12_v1, -inf  ;;  %v39_v15 = vand.u32 127, %v38_v13 }
   0x3   :  { %41 = vperm.xlu1 %78, %v36_v3   ;;  %15 = vmax.xlane.f32.xlu0 %v14_v4 }
   0x7   :  { %44 = vperm.xlu1 %78, %v37_v5   ;;  %18 = vmax.xlane.f32.xlu0 %v17_v6 }
  0x7e   :  { %v42_v14 = vpop.permute.xlu1 %41 }
  0x7f   :  { %vm46_vm1 = vcmp.eq.s32.totalorder %v39_v15, %v42_v14 }
  0x82   :  { %v45_v17 = vpop.permute.xlu1 %44 }
  0x83   :  { %vm47_vm2 = vcmp.eq.s32.totalorder %v39_v15, %v45_v17 }
  0x8c   :  { %v16_v7 = vpop.xlane.xlu0 %15 }
  0x8d   :  { %v20_v8 = vsub.f32 %v11_v0, %v16_v7 }
  0x8f   :  { %v22_v9 = vmul.f32 1.442695, %v20_v8  ;;  %v48_v19 = vsel %vm46_vm1, %v20_v8, 0.0  ;;  %v56_v25 = vsel %vm13_vm0, %v20_v8, 0.0 }
  0x90   :  { %v19_v10 = vpop.xlane.xlu0 %18  ;;  %v50_v21 = vsel %vm13_vm0, %v48_v19, 0.0 }
  0x91   :  { %80 = vpow2.f32 %v22_v9  ;;  %v21_v11 = vsub.f32 %v12_v1, %v19_v10 }
  0x93   :  { %v24_v12 = vmul.f32 1.442695, %v21_v11  ;;  %v49_v23 = vsel %vm47_vm2, %v21_v11, 0.0  ;;  %v59_v26 = vsel %vm13_vm0, %v21_v11, 0.0 }
  0x94   :  { %v53_v24 = vsel %vm13_vm0, %v49_v23, 0.0 }
  0x95   :  { %82 = vpow2.f32 %v24_v12 }
  0x9e   :  { %v81_v16 = vpop.eup %80 }
  0x9f   :  { %v26_v18 = vsel %vm13_vm0, %v81_v16, 0.0 }
  0xa0   :  { %27 = vadd.xlane.f32.xlu0 %v26_v18 }
  0xa2   :  { %v83_v20 = vpop.eup %82 }
  0xa3   :  { %v29_v22 = vsel %vm13_vm0, %v83_v20, 0.0 }
  0xa4   :  { %51 = vadd.xlane.f32.xlu0 %v50_v21  ;;  %30 = vadd.xlane.f32.xlu1 %v29_v22 }
  0xa8   :  { %54 = vadd.xlane.f32.xlu0 %v53_v24 }
  0xac   :  { %57 = vadd.xlane.f32.xlu0 %v56_v25 }
  0xb0   :  { %60 = vadd.xlane.f32.xlu0 %v59_v26 }
 0x129   :  { %v28_v27 = vpop.xlane.xlu0 %27 }
 0x12a   :  { %84 = vlog2.f32 %v28_v27 }
 0x12d   :  { %v31_v28 = vpop.xlane.xlu1 %30  ;;  %v52_v29 = vpop.xlane.xlu0 %51 }
 0x12e   :  { %86 = vlog2.f32 %v31_v28  ;;  %v62_v34 = vmul.f32 0.9, %v52_v29 }
 0x131   :  { %v55_v30 = vpop.xlane.xlu0 %54 }
 0x132   :  { %v63_v40 = vmul.f32 0.9, %v55_v30 }
 0x135   :  { %v58_v31 = vpop.xlane.xlu0 %57 }
 0x136   :  { %v66_v36 = vmul.f32 0.003125, %v58_v31 }
 0x137   :  { %v85_v32 = vpop.eup %84 }
 0x138   :  { %v33_v33 = vmul.f32 0.6931472, %v85_v32 }
 0x139   :  { %v61_v38 = vpop.xlane.xlu0 %60 }
 0x13a   :  { %v64_v35 = vsub.f32 %v33_v33, %v62_v34  ;;  %v67_v43 = vmul.f32 0.003125, %v61_v38 }
 0x13b   :  { %v87_v37 = vpop.eup %86 }
 0x13c   :  { %v35_v39 = vmul.f32 0.6931472, %v87_v37  ;;  %v68_v41 = vsub.f32 %v64_v35, %v66_v36 }
 0x13e   :  { %v65_v42 = vsub.f32 %v35_v39, %v63_v40  ;;  %71 = vst.msk [vmem:[%s132_s2] sm:$0xff] %vm70_vm3, %v68_v41 }
 0x140   :  { %v69_v44 = vsub.f32 %v65_v42, %v67_v43 }
 0x142   :  { %72 = vst.msk [vmem:[%s132_s2 + $0x8] sm:$0xff] %vm70_vm3, %v69_v44 }

</bundles_post_ra>
